<compile_context>
chip_gen: v5e
topology: v5e:2x2
jax: 0.10.0
libtpu: 0.0.40
codegen_flags: <defaults>
</compile_context>

<pallas_src>
import functools

import jax
import jax.numpy as jnp
from jax import lax
from jax.experimental import pallas as pl
from jax.experimental.pallas import tpu as pltpu


def _round_up(a: int, b: int) -> int:
    return (a + b - 1) // b * b


def _vmem_budget_bytes() -> int:
    """Per-TensorCore usable VMEM budget (physical capacity minus headroom)."""
    phys = 64 << 20  # conservative fallback (= v7x per-TC VMEM; only under-uses v5e/v6e)
    try:
        info = pltpu.get_tpu_info()
        cap = int(getattr(info, "vmem_capacity_bytes", 0) or 0)
        if cap > 0:
            phys = cap
    except Exception:
        # Hardware query unavailable (e.g. interpret mode) -> keep conservative fallback.
        pass
    # ~13/16 of physical: ~104 MiB on v5e/v6e (128 MiB), ~52 MiB on v7x (64 MiB).
    return (phys * 13) // 16


# --------------------------------------------------------------------------- #
# Kernels
# --------------------------------------------------------------------------- #
def _resident_kernel(x_ref, w_ref, b_ref, o_ref):
    """Small-vocab path: full (D, V) weight resident, single-shot log_softmax."""
    x = x_ref[...].astype(jnp.bfloat16)            # in-kernel cast (hidden under MXU)
    logits = jnp.dot(x, w_ref[...], preferred_element_type=jnp.float32) + b_ref[...]
    m = jnp.max(logits, axis=-1, keepdims=True)
    shifted = logits - m
    lse = jnp.log(jnp.sum(jnp.exp(shifted), axis=-1, keepdims=True))
    o_ref[...] = (shifted - lse).astype(o_ref.dtype)


def _streaming_kernel(x_ref, w_ref, b_ref, o_ref, m_ref, l_ref, *, tv, v_total):
    """Large-vocab path: grid (Mb, 2, Vb).

    Pass p=0: online logsumexp over streamed vocab blocks (running max m, sum l).
    Pass p=1: recompute the logits block, write logits - lse (f32 math, bf16 store).
    The matmul is recomputed in pass 1 (2x MXU flops / weight reads) so that no
    (tm, V)-sized buffer is ever resident in VMEM.
    """
    p = pl.program_id(1)
    j = pl.program_id(2)
    nj = pl.num_programs(2)

    x = x_ref[...].astype(jnp.bfloat16)
    logits = jnp.dot(x, w_ref[...], preferred_element_type=jnp.float32) + b_ref[...]
    if v_total % tv != 0:
        # Ragged final vocab block: mask out-of-range columns before any reduction.
        col = j * tv + lax.broadcasted_iota(jnp.int32, logits.shape, 1)
        logits = jnp.where(col < v_total, logits, -jnp.inf)

    @pl.when((p == 0) & (j == 0))
    def _init():
        m_ref[...] = jnp.full(m_ref.shape, -jnp.inf, m_ref.dtype)
        l_ref[...] = jnp.zeros(l_ref.shape, l_ref.dtype)

    @pl.when(p == 0)
    def _accumulate():
        m_prev = m_ref[...]
        m_new = jnp.maximum(m_prev, jnp.max(logits, axis=-1, keepdims=True))
        l_ref[...] = l_ref[...] * jnp.exp(m_prev - m_new) + jnp.sum(
            jnp.exp(logits - m_new), axis=-1, keepdims=True)
        m_ref[...] = m_new

    @pl.when((p == 0) & (j == nj - 1))
    def _finalize_lse():
        # Fold the running (max, sum) into the final log-sum-exp for pass 1.
        m_ref[...] = m_ref[...] + jnp.log(l_ref[...])

    @pl.when(p == 1)
    def _write():
        o_ref[...] = (logits - m_ref[...]).astype(o_ref.dtype)


# --------------------------------------------------------------------------- #
# pallas_call wrappers
# --------------------------------------------------------------------------- #
def _resident_call(x2, wb, b2, *, tm, out_dtype, vmem_limit):
    M, D = x2.shape
    V = wb.shape[1]
    return pl.pallas_call(
        _resident_kernel,
        out_shape=jax.ShapeDtypeStruct((M, V), out_dtype),
        grid_spec=pltpu.PrefetchScalarGridSpec(
            num_scalar_prefetch=0,
            grid=(pl.cdiv(M, tm),),
            in_specs=[
                pl.BlockSpec((tm, D), lambda i: (i, 0)),   # x row tile
                pl.BlockSpec((D, V), lambda i: (0, 0)),    # resident weight
                pl.BlockSpec((1, V), lambda i: (0, 0)),    # bias
            ],
            out_specs=pl.BlockSpec((tm, V), lambda i: (i, 0)),   # lane-dense output
        ),
        compiler_params=pltpu.CompilerParams(
            dimension_semantics=("parallel",),
            vmem_limit_bytes=int(vmem_limit),
        ),
    )(x2, wb, b2)


def _streaming_call(x2, wb, b2, *, tm, tv, out_dtype, vmem_limit):
    M, D = x2.shape
    V = wb.shape[1]
    kernel = functools.partial(_streaming_kernel, tv=tv, v_total=V)
    # Output index map: during pass 0 park on block (i, 0) (no stores happen, no
    # flushes); during pass 1 visit (i, j) and write the finalized block.
    return pl.pallas_call(
        kernel,
        out_shape=jax.ShapeDtypeStruct((M, V), out_dtype),
        grid_spec=pltpu.PrefetchScalarGridSpec(
            num_scalar_prefetch=0,
            grid=(pl.cdiv(M, tm), 2, pl.cdiv(V, tv)),
            in_specs=[
                pl.BlockSpec((tm, D), lambda i, p, j: (i, 0)),   # x row tile (fetched once/row)
                pl.BlockSpec((D, tv), lambda i, p, j: (0, j)),   # streamed weight block
                pl.BlockSpec((1, tv), lambda i, p, j: (0, j)),   # bias block
            ],
            out_specs=pl.BlockSpec((tm, tv), lambda i, p, j: (i, p * j)),
            scratch_shapes=[
                pltpu.VMEM((tm, 1), jnp.float32),   # running max -> final lse
                pltpu.VMEM((tm, 1), jnp.float32),   # running sum-exp
            ],
        ),
        compiler_params=pltpu.CompilerParams(
            dimension_semantics=("parallel", "arbitrary", "arbitrary"),
            vmem_limit_bytes=int(vmem_limit),
        ),
    )(x2, wb, b2)


# --------------------------------------------------------------------------- #
# Public wrapper
# --------------------------------------------------------------------------- #
def generator_forward(x, w, b, *, out_dtype=jnp.bfloat16, mode="auto",
                      tm=None, tv=None):
    """log_softmax(x @ w + b, axis=-1).

    x: (..., D) activations (f32 or bf16; cast to bf16 inside the kernel).
    w: (D, V) projection weight = nn.Linear.weight.T.  Pass it pre-cast to bf16
       (cast once, reuse) to avoid a per-call f32->bf16 HBM copy.
    b: (V,) bias.
    Returns (..., V) log-probabilities in `out_dtype` (default bfloat16; use
    float32 for reference-matching numerics).
    """
    *batch, D = x.shape
    V = w.shape[-1]
    assert w.shape == (D, V), f"expected weight shape {(D, V)}, got {w.shape}"
    M = 1
    for s_ in batch:
        M *= int(s_)

    x2 = x.reshape(M, D)                                   # no dtype cast here
    wb = w if w.dtype == jnp.bfloat16 else w.astype(jnp.bfloat16)
    b2 = jnp.asarray(b, jnp.float32).reshape(1, V)

    budget = _vmem_budget_bytes()
    x_b = x2.dtype.itemsize
    o_b = jnp.dtype(out_dtype).itemsize
    slack = 1 << 20

    def resident_bytes(tm_):
        return (2 * D * V * 2                 # weight (worst-case double-buffered)
                + 2 * tm_ * D * x_b           # x tiles (double-buffered)
                + 2 * tm_ * V * o_b           # output tiles (double-buffered)
                + 3 * tm_ * V * 4             # f32 logits / exp temporaries
                + 2 * V * 4 + slack)

    def stream_bytes(tm_, tv_):
        return (2 * tm_ * D * x_b
                + 2 * D * tv_ * 2             # streamed weight blocks (double-buffered)
                + 2 * tm_ * tv_ * o_b         # output blocks
                + 3 * tm_ * tv_ * 4           # f32 logits / exp temporaries
                + 2 * tv_ * 4 + 2 * tm_ * 4 + slack)

    m_cap = _round_up(M, 16)
    v_cap = _round_up(V, 128)
    tm_cands = ([min(_round_up(tm, 16), m_cap)] if tm else
                [min(t, m_cap) for t in (512, 256, 128, 64, 32, 16)])
    tm_cands = sorted(set(tm_cands), reverse=True)
    tv_cands = ([min(_round_up(tv, 128), v_cap)] if tv else
                [min(t, v_cap) for t in (4096, 2048, 1024, 512, 256, 128)])
    tv_cands = sorted(set(tv_cands), reverse=True)

    plan = None
    if mode in ("auto", "resident"):
        for tm_ in tm_cands:
            if resident_bytes(tm_) <= budget:
                plan = ("resident", tm_, V)
                break
        if plan is None and mode == "resident":
            raise ValueError("resident-weight path does not fit the VMEM budget; "
                             "use mode='stream' or mode='auto'")
    if plan is None:
        if mode not in ("auto", "stream"):
            raise ValueError(f"unknown mode {mode!r}")
        for tm_ in tm_cands:
            for tv_ in tv_cands:
                if stream_bytes(tm_, tv_) <= budget:
                    plan = ("stream", tm_, tv_)
                    break
            if plan is not None:
                break
        if plan is None:
            raise ValueError(f"no (tm, tv) tiling fits the VMEM budget for D={D}, V={V}")

    kind, tm_sel, tv_sel = plan
    if kind == "resident":
        out = _resident_call(x2, wb, b2, tm=tm_sel, out_dtype=out_dtype,
                             vmem_limit=budget)
    else:
        out = _streaming_call(x2, wb, b2, tm=tm_sel, tv=tv_sel,
                              out_dtype=out_dtype, vmem_limit=budget)
    return out.reshape(tuple(batch) + (V,))


def init_params(key, d_model, vocab):
    """Mimic nn.Linear default init, stored as W^T (D, V) so the kernel does x @ W^T + b."""
    kw, kb = jax.random.split(key)
    bound = 1.0 / (d_model ** 0.5)
    w = jax.random.uniform(kw, (d_model, vocab), jnp.float32, -bound, bound)
    b = jax.random.uniform(kb, (vocab,), jnp.float32, -bound, bound)
    return w, b


# --------------------------------------------------------------------------- #
# Demo / correctness checks
# --------------------------------------------------------------------------- #
if __name__ == "__main__":
    key = jax.random.PRNGKey(0)

    def reference_bf16(x, w, b):
        """Same bf16 operands / f32 accumulation as the kernel -> tight reference."""
        D_, V_ = w.shape
        logits = jnp.dot(x.reshape(-1, D_).astype(jnp.bfloat16),
                         w.astype(jnp.bfloat16),
                         preferred_element_type=jnp.float32) + b
        return jax.nn.log_softmax(logits, axis=-1).reshape(*x.shape[:-1], V_)

    # --- Case 1: small vocab -> resident fast path ---------------------------
    B, S, D, V = 2, 8, 32, 128
    k1, k2, key = jax.random.split(key, 3)
    x = jax.random.normal(k1, (B, S, D), dtype=jnp.float32)
    w, b = init_params(k2, D, V)
    wb = w.astype(jnp.bfloat16)          # hoisted one-time weight cast (reused below)

    out = jax.block_until_ready(generator_forward(x, wb, b, out_dtype=jnp.float32))
    assert out.shape == (B, S, V)
    ref = reference_bf16(x, w, b)
    assert jnp.allclose(out, ref, atol=1e-4, rtol=1e-4), "resident path mismatch"

    # Default bf16 output, loose check against full-f32 PyTorch semantics.
    out_bf16 = jax.block_until_ready(generator_forward(x, wb, b))
    assert out_bf16.dtype == jnp.bfloat16
    ref_f32 = jax.nn.log_softmax(x.reshape(-1, D) @ w + b, axis=-1).reshape(B, S, V)
    assert jnp.allclose(out_bf16.astype(jnp.float32), ref_f32, atol=5e-2, rtol=5e-2), \
        "bf16-output path mismatch"

    # --- Case 2: forced streaming (online logsumexp) path --------------------
    # Ragged row tile (M=14 vs tm=16) and ragged final vocab block (V=320 vs tv=128).
    B2, S2, D2, V2 = 2, 7, 32, 320
    k1, k2, key = jax.random.split(key, 3)
    x2 = jax.random.normal(k1, (B2, S2, D2), dtype=jnp.float32)
    w2, b2 = init_params(k2, D2, V2)

    out2 = jax.block_until_ready(
        generator_forward(x2, w2.astype(jnp.bfloat16), b2,
                          out_dtype=jnp.float32, mode="stream", tm=16, tv=128))
    assert out2.shape == (B2, S2, V2)
    ref2 = reference_bf16(x2, w2, b2)
    assert jnp.allclose(out2, ref2, atol=1e-4, rtol=1e-4), "streaming path mismatch"

    print("KERNEL_OK")
</pallas_src>

<mosaic_0001>
module attributes {stable_mosaic.version = 11 : i64} {
  func.func @_resident_kernel(%arg0: i32, %arg1: memref<16x32xf32, #tpu.memory_space<vmem>>, %arg2: memref<32x128xbf16, #tpu.memory_space<vmem>>, %arg3: memref<1x128xf32, #tpu.memory_space<vmem>>, %arg4: memref<16x128xf32, #tpu.memory_space<vmem>>) attributes {dimension_semantics = [#tpu.dimension_semantics<parallel>], iteration_bounds = array<i64: 1>, scalar_prefetch = 0 : i64, scratch_operands = 0 : i64, tpu.core_type = #tpu.core_type<tc>, window_params = [{transform_indices = @transform_0, window_bounds = array<i64: 16, 32>}, {pipeline_mode = #tpu.pipeline_mode<synchronous>, transform_indices = @transform_1, window_bounds = array<i64: 32, 128>}, {pipeline_mode = #tpu.pipeline_mode<synchronous>, transform_indices = @transform_2, window_bounds = array<i64: 1, 128>}, {transform_indices = @transform_3, window_bounds = array<i64: 16, 128>}]} {
    %c0 = arith.constant 0 : index
    %c0_0 = arith.constant 0 : index
    %0 = vector.load %arg1[%c0, %c0_0] : memref<16x32xf32, #tpu.memory_space<vmem>>, vector<16x32xf32>
    %1 = arith.truncf %0 : vector<16x32xf32> to vector<16x32xbf16>
    %c0_1 = arith.constant 0 : index
    %c0_2 = arith.constant 0 : index
    %2 = vector.load %arg2[%c0_1, %c0_2] : memref<32x128xbf16, #tpu.memory_space<vmem>>, vector<32x128xbf16>
    %cst = arith.constant dense<0.000000e+00> : vector<16x128xf32>
    %3 = tpu.matmul %1, %2, %cst {dimension_numbers = #tpu.dot_dimension_numbers<[1], [0], [0], [1], [0, 0, 1, 1], [], []>} : vector<16x32xbf16>, vector<32x128xbf16>, vector<16x128xf32> -> vector<16x128xf32>
    %c0_3 = arith.constant 0 : index
    %c0_4 = arith.constant 0 : index
    %4 = vector.load %arg3[%c0_3, %c0_4] : memref<1x128xf32, #tpu.memory_space<vmem>>, vector<1x128xf32>
    %5 = vector.broadcast %4 : vector<1x128xf32> to vector<16x128xf32>
    %6 = arith.addf %3, %5 : vector<16x128xf32>
    %cst_5 = arith.constant dense<0xFF800000> : vector<16xf32>
    %7 = vector.multi_reduction <maximumf>, %6, %cst_5 [1] : vector<16x128xf32> to vector<16xf32>
    %8 = vector.shape_cast %7 : vector<16xf32> to vector<16x1xf32>
    %9 = vector.broadcast %8 : vector<16x1xf32> to vector<16x128xf32>
    %10 = arith.subf %6, %9 : vector<16x128xf32>
    %11 = math.exp %10 : vector<16x128xf32>
    %cst_6 = arith.constant dense<0.000000e+00> : vector<16xf32>
    %12 = vector.multi_reduction <add>, %11, %cst_6 [1] : vector<16x128xf32> to vector<16xf32>
    %13 = vector.shape_cast %12 : vector<16xf32> to vector<16x1xf32>
    %14 = math.log %13 : vector<16x1xf32>
    %15 = vector.broadcast %14 : vector<16x1xf32> to vector<16x128xf32>
    %16 = arith.subf %10, %15 : vector<16x128xf32>
    %c0_7 = arith.constant 0 : index
    %c0_8 = arith.constant 0 : index
    %17 = vector.load %arg4[%c0_7, %c0_8] : memref<16x128xf32, #tpu.memory_space<vmem>>, vector<16x128xf32>
    tpu.vector_store %arg4[%c0_7, %c0_8], %16 {strides = array<i32>} : memref<16x128xf32, #tpu.memory_space<vmem>>, vector<16x128xf32>,
    return
  }
  func.func @transform_0(%arg0: i32) -> (i32, i32) {
    %c0_i32 = arith.constant 0 : i32
    %c0_i32_0 = arith.constant 0 : i32
    return %arg0, %c0_i32 : i32, i32
  }
  func.func @transform_1(%arg0: i32) -> (i32, i32) {
    %c0_i32 = arith.constant 0 : i32
    %c0_i32_0 = arith.constant 0 : i32
    %c0_i32_1 = arith.constant 0 : i32
    return %c0_i32, %c0_i32_0 : i32, i32
  }
  func.func @transform_2(%arg0: i32) -> (i32, i32) {
    %c0_i32 = arith.constant 0 : i32
    %c0_i32_0 = arith.constant 0 : i32
    %c0_i32_1 = arith.constant 0 : i32
    return %c0_i32, %c0_i32_0 : i32, i32
  }
  func.func @transform_3(%arg0: i32) -> (i32, i32) {
    %c0_i32 = arith.constant 0 : i32
    %c0_i32_0 = arith.constant 0 : i32
    return %arg0, %c0_i32 : i32, i32
  }
}

</mosaic_0001>

<bundles_post_ra>
// kernel: tpu_custom_call.1
= control target key start
LH: loop header
LB: loop body
LE: loop exit
PB: predicated region body
PF: predicated region fallthrough
CT: control target
= control target key end

     0   :  { %8 = vsyncpa [#allocation3], 0  ;;  %s281_s0 = inlined_call_operand.hbm [shape: f32[16,32], index: 0, kind: input, shape index: {}]   ;;  %s282_s1 = inlined_call_operand.hbm [shape: bf16[32,128], index: 1, kind: input, shape index: {}]   ;;  %s283_s2 = inlined_call_operand.vmem [shape: f32[1,128], index: 2, kind: input, shape index: {}]   ;;  %s284_s3 = inlined_call_operand.hbm [shape: f32[16,128], index: 3, kind: output, shape index: {}]  }
   0x1   :  { %9 = vsyncpa [#allocation6], 0 }
   0x2   :  { %10 = vsyncpa [#allocation4], 0  ;;  %s15_s14 = sshll.u32 %s281_s0, 4  ;;  %s236_s15 = smov [#allocation2]   ;;  %s16_s14 = int_to_ptr.hbm [resolvable:$true] %s15_s14 }
   0x3   :  { %s17_s16 = sshll.u32 %s236_s15, 4  ;;  %s28_s19 = sshll.u32 %s282_s1, 4  ;;  %s18_s16 = int_to_ptr.vmem [resolvable:$true] %s17_s16  ;;  %s29_s19 = int_to_ptr.hbm [resolvable:$true] %s28_s19 }
   0x4   :  { %s237_s20 = smov 128   ;;  %s238_s21 = smov 8  }
   0x5   :  { %23 = dma.hbm_to_vmem [thread:$0]  %s16_s14, 256, %s18_s16, [#allocation3], %s237_s20, %s237_s20, %s238_s21  }
   0x6   :  { %s239_s22 = smov [#allocation5]   ;;  %s240_s24 = smov 64  }
   0x7   :  { %s30_s23 = sshll.u32 %s239_s22, 4  ;;  %s241_s0 = smov 4   ;;  %s31_s23 = int_to_ptr.vmem [resolvable:$true] %s30_s23 }
   0x8   :  { %36 = dma.hbm_to_vmem [thread:$0]  %s29_s19, 256, %s31_s23, [#allocation6], %s240_s24, %s240_s24, %s241_s0  }
   0x9   :  { %230 = dma.done.wait [#allocation3], 256  }
   0xa   :  { %231 = vsyncadd [#allocation3], 4294967040 }
   0xb   :  { %232 = dma.done.wait [#allocation6], 256  }
   0xc   :  { %233 = vsyncadd [#allocation6], 4294967040  ;;  %v141_v0 = vld [vmem:[#allocation5 + $0x8] sm:$0xff]  ;;  %v140_v1 = vld [vmem:[#allocation5] sm:$0xff]  ;;  %vm71_vm0 = vcmask 261120   ;;  %s117_s29 = sshll.u32 %s284_s3, 4  ;;  %s118_s29 = int_to_ptr.hbm [resolvable:$true] %s117_s29 }
   0xd   :  { %81 = vmatpush.bf16.msra.mxu0 %v141_v0  ;;  %v48_v2 = vld [vmem:[#allocation2] sm:$0xff]  ;;  %v49_v3 = vld [vmem:[#allocation2 + $0x8] sm:$0xff] }
   0xe   :  { %v50_v4 = vpack.c.bf16 %v49_v3, %v48_v2  ;;  %v149_v5 = vld [vmem:[%s283_s2] ss:$0 sm:$0xff]  ;;  %s242_s2 = smov [#allocation7]  }
   0xf   :  { %s115_s26 = sshll.u32 %s242_s2, 4  ;;  %s116_s26 = int_to_ptr.vmem [resolvable:$true] %s115_s26 }
  0x11   :  { %82 = vmatpush.bf16.msra.mxu0 %v140_v1 }
  0x14   :  { %139 = vmatmul.msk.bf16.vlgmr.msra.gmra.mxu0 %vm71_vm0, %v50_v4 }
  0x91   :  { %v84_v6 = vpop.f32.mrf.mxu0 }
  0x92   :  { %v85_v7 = vadd.f32 %v149_v5, %v84_v6 }
  0x94   :  { %89 = vmax.xlane.f32.xlu0 %v85_v7 }
  0x99   :  { %v86_v8 = vpop.f32.mrf.mxu0 }
  0x9a   :  { %v87_v9 = vadd.f32 %v149_v5, %v86_v8 }
  0x9c   :  { %91 = vmax.xlane.f32.xlu0 %v87_v9 }
 0x107   :  { %v90_v10 = vpop.xlane.xlu0 %89 }
 0x108   :  { %v93_v11 = vsub.f32 %v85_v7, %v90_v10 }
 0x10a   :  { %v95_v12 = vmul.f32 1.442695, %v93_v11 }
 0x10c   :  { %150 = vpow2.f32 %v95_v12 }
 0x10f   :  { %v92_v13 = vpop.xlane.xlu0 %91 }
 0x110   :  { %v94_v14 = vsub.f32 %v87_v9, %v92_v13 }
 0x112   :  { %v151_v15 = vpop.eup %150  ;;  %v97_v16 = vmul.f32 1.442695, %v94_v14 }
 0x113   :  { %99 = vadd.xlane.f32.xlu1 %v151_v15 }
 0x114   :  { %152 = vpow2.f32 %v97_v16 }
 0x11a   :  { %v153_v17 = vpop.eup %152 }
 0x11b   :  { %101 = vadd.xlane.f32.xlu1 %v153_v17 }
 0x186   :  { %v100_v18 = vpop.xlane.xlu1 %99 }
 0x187   :  { %154 = vlog2.f32 %v100_v18 }
 0x18d   :  { %v155_v19 = vpop.eup %154 }
 0x18e   :  { %v104_v20 = vmul.f32 0.6931472, %v155_v19  ;;  %v102_v21 = vpop.xlane.xlu1 %101 }
 0x18f   :  { %156 = vlog2.f32 %v102_v21 }
 0x190   :  { %v107_v22 = vsub.f32 %v93_v11, %v104_v20 }
 0x192   :  { %109 = vst [vmem:[#allocation7] sm:$0xff] %v107_v22 }
 0x195   :  { %v157_v23 = vpop.eup %156 }
 0x196   :  { %v106_v24 = vmul.f32 0.6931472, %v157_v23 }
 0x198   :  { %v108_v25 = vsub.f32 %v94_v14, %v106_v24 }
 0x19a   :  { %110 = vst [vmem:[#allocation7 + $0x8] sm:$0xff] %v108_v25 }
 0x19b   :  { %123 = dma.vmem_to_hbm [thread:$0]  %s116_s26, 256, %s118_s29, [#allocation4], %s237_s20, %s237_s20, %s238_s21  }
 0x19c   :  { %234 = dma.done.wait [#allocation4], 256  }
 0x19d   :  { %235 = vsyncadd [#allocation4], 4294967040 }
 0x19e   :  { %128 = vsyncpa [#allocation3], 1 }
 0x19f   :  { %129 = vsyncpa [#allocation6], 1 }
 0x1a0   :  { %130 = vsyncpa [#allocation4], 1 }

</bundles_post_ra>
